<compile_context>
chip_gen: v7x
topology: tpu7x:2x2x1
jax: 0.10.0
libtpu: 0.0.40
codegen_flags: <defaults>
</compile_context>

<pallas_src>
import jax
import jax.numpy as jnp
from jax.experimental import pallas as pl
from jax.experimental.pallas import tpu as pltpu

B = 2                       # batch
H_IN = W_IN = 2             # input spatial (forced by the 32*3*3 flatten size)
C_IN, C_OUT = 3, 32
HP = WP = H_IN + 2          # spatial after padding=1 (1x1 conv keeps it)
HPOOL = WPOOL = HP - 1      # MaxPool2d(kernel=2, stride=1) output spatial
FEAT = C_OUT * HPOOL * WPOOL    # 288
HID = 128
NCLASS = 10

NPIX = HP * WP              # 16 padded pixels
LANES = NPIX * C_OUT        # 512 ; lane index = h*128 + w*32 + c_out

# ---- packed f32 "conv matrix + biases" array (24, 512) ----------------------
_CM_K = C_IN * H_IN * W_IN  # 12 : rows [0,12)  conv-as-matmul matrix M
_CBIAS_ROW = 16             # row 16 : conv bias tiled over the 16 pixels
_B1_ROW = 17                # row 17 : Linear1 bias in lanes [0,128)
_B2_ROW = 18                # row 18 : Linear2 bias in lanes [0,10)
_CM_ROWS = 24

# ---- packed bf16 matmul-weight slab (640, 128) ------------------------------
# rows [0,512)   zero-embedded Linear1 weight (lane layout = pool lane layout)
# rows [512,640) lane-padded Linear2 weight


def mynet_kernel(x_ref, cm_ref, wb_ref, out_ref):
    # x_ref  : (B, 12)    f32  -- contiguous NCHW flatten of the (B,3,2,2) input
    # cm_ref : (24, 512)  f32  -- conv matrix + conv/L1/L2 biases (all f32)
    # wb_ref : (640, 128) bf16 -- Linear1 (512 rows) + Linear2 (128 rows)
    # out_ref: (B, 128)   f32  -- lane-dense logits (classes in lanes 0..9)

    # --- Conv2d(3,32,1,padding=1) + bias + ReLU as ONE small MXU matmul ------
    # The static matrix folds the zero padding and the 32-lane broadcast;
    # boundary lanes get bias only, exactly matching the PyTorch conv.
    conv = jnp.dot(x_ref[...], cm_ref[0:_CM_K, :],
                   preferred_element_type=jnp.float32)                # (B,512)
    conv = jnp.maximum(conv + cm_ref[_CBIAS_ROW:_CBIAS_ROW + 1, :], 0.0)

    # --- MaxPool2d(2, stride=1) via XLU lane rolls ---------------------------
    # Pool position (i,j,c) lives at lane i*128 + j*32 + c; its four window
    # corners sit at lane offsets +0, +32, +128, +160.  The +128 rolls are
    # whole-vreg permutations; +160 reuses the +32 copy.  Lanes with i==3 /
    # j==3 (and roll wraparound) carry garbage but hit zero rows of wb_ref.
    r32 = pltpu.roll(conv, LANES - 32, axis=1)     # conv[l+32]
    r128 = pltpu.roll(conv, LANES - 128, axis=1)   # conv[l+128]  (vreg permute)
    r160 = pltpu.roll(r32, LANES - 128, axis=1)    # conv[l+160]  (vreg permute)
    p = jnp.maximum(jnp.maximum(conv, r32), jnp.maximum(r128, r160))

    # --- Linear(288,128): single K=512 bf16 MXU matmul + f32 bias + ReLU -----
    h = jnp.dot(p.astype(jnp.bfloat16), wb_ref[0:LANES, :],
                preferred_element_type=jnp.float32)
    h = jnp.maximum(h + cm_ref[_B1_ROW:_B1_ROW + 1, 0:HID], 0.0)

    # --- Linear(128,10): lane-padded to 128, lane-dense store ----------------
    logits = jnp.dot(h.astype(jnp.bfloat16), wb_ref[LANES:LANES + HID, :],
                     preferred_element_type=jnp.float32)
    out_ref[...] = logits + cm_ref[_B2_ROW:_B2_ROW + 1, 0:HID]


def prepare_kernel_params(params):
    """One-time re-layout of PyTorch-style params into 2 packed kernel arrays."""
    conv_w, conv_b, w1, b1, w2, b2 = params
    wc = conv_w.reshape(C_OUT, C_IN).astype(jnp.float32)

    # Conv-as-matmul: M[c_in*4 + hi*2 + wi, (hi+1)*128 + (wi+1)*32 + c_out]
    #   = wc[c_out, c_in]  (interior pixels only; padded pixels stay zero).
    m = jnp.zeros((_CM_K, HP, WP, C_OUT), jnp.float32)
    for ci in range(C_IN):
        for hi in range(H_IN):
            for wi in range(W_IN):
                r = ci * (H_IN * W_IN) + hi * W_IN + wi
                m = m.at[r, hi + 1, wi + 1, :].set(wc[:, ci])
    m = m.reshape(_CM_K, LANES)                                       # (12,512)

    cb_row = jnp.tile(conv_b.astype(jnp.float32), NPIX)[None, :]      # (1,512)
    b1_row = jnp.zeros((1, LANES), jnp.float32).at[0, :HID].set(b1)
    b2_row = jnp.zeros((1, LANES), jnp.float32).at[0, :NCLASS].set(b2)
    cm_pack = jnp.concatenate(
        [m, jnp.zeros((4, LANES), jnp.float32), cb_row, b1_row, b2_row,
         jnp.zeros((5, LANES), jnp.float32)], axis=0)                 # (24,512)
    assert cm_pack.shape == (_CM_ROWS, LANES)

    # Linear1: PyTorch flatten of (B, C, 3, 3) is c*9 + i*3 + j -> reorder to
    # (i, j, c, n) and zero-embed into the full 4x4 padded lane grid so only
    # valid pool positions (i, j <= 2) contribute.
    w1_t = w1.reshape(HID, C_OUT, HPOOL, WPOOL).transpose(2, 3, 1, 0)
    w1e = jnp.zeros((HP, WP, C_OUT, HID), jnp.float32)
    w1e = w1e.at[:HPOOL, :WPOOL].set(w1_t).reshape(LANES, HID)        # (512,128)

    # Linear2: lane-pad 10 -> 128 with zeros.
    w2p = jnp.zeros((HID, HID), jnp.float32).at[:, :NCLASS].set(w2.T)

    wb_pack = jnp.concatenate([w1e, w2p], axis=0).astype(jnp.bfloat16)  # (640,128)
    assert wb_pack.shape == (LANES + HID, HID)
    return cm_pack, wb_pack


def _forward_impl(x_nchw, cm_pack, wb_pack):
    b = x_nchw.shape[0]
    # Contiguous NCHW flatten -> (B, 12): free reshape, no XLA prologue op.
    x12 = x_nchw.reshape(b, C_IN * H_IN * W_IN).astype(jnp.float32)

    out = pl.pallas_call(
        mynet_kernel,
        out_shape=jax.ShapeDtypeStruct((b, HID), jnp.float32),   # lane-dense
        in_specs=[pl.BlockSpec(memory_space=pltpu.MemorySpace.VMEM)] * 3,
        out_specs=pl.BlockSpec(memory_space=pltpu.MemorySpace.VMEM),
    )(x12, cm_pack, wb_pack)
    return out[:, :NCLASS]       # cheap wrapper slice; fuses into the consumer


# jit the whole forward: one free reshape + one Pallas custom call per call.
mynet3_3_forward = jax.jit(_forward_impl)


def init_params(key):
    """Deterministic PyTorch-style uniform(-1/sqrt(fan_in), 1/sqrt(fan_in)) init."""
    ks = jax.random.split(key, 6)

    def u(k, shape, fan_in):
        bound = 1.0 / float(fan_in) ** 0.5
        return jax.random.uniform(k, shape, jnp.float32, -bound, bound)

    conv_w = u(ks[0], (C_OUT, C_IN, 1, 1), C_IN)     # Conv2d(3,32,1).weight
    conv_b = u(ks[1], (C_OUT,), C_IN)                # Conv2d(3,32,1).bias
    w1 = u(ks[2], (HID, FEAT), FEAT)                 # Linear(288,128).weight
    b1 = u(ks[3], (HID,), FEAT)                      # Linear(288,128).bias
    w2 = u(ks[4], (NCLASS, HID), HID)                # Linear(128,10).weight
    b2 = u(ks[5], (NCLASS,), HID)                    # Linear(128,10).bias
    return conv_w, conv_b, w1, b1, w2, b2


def reference_forward(x_nchw, params):
    """Plain-JAX f32 reference reproducing the PyTorch NCHW semantics exactly."""
    conv_w, conv_b, w1, b1, w2, b2 = params
    xp = jnp.pad(x_nchw, ((0, 0), (0, 0), (1, 1), (1, 1)))
    conv = jnp.einsum('bchw,oc->bohw', xp, conv_w.reshape(C_OUT, C_IN)) \
        + conv_b[None, :, None, None]
    conv = jnp.maximum(conv, 0.0)
    p = jnp.maximum(
        jnp.maximum(conv[:, :, :-1, :-1], conv[:, :, :-1, 1:]),
        jnp.maximum(conv[:, :, 1:, :-1], conv[:, :, 1:, 1:]),
    )
    feat = p.reshape(p.shape[0], -1)                 # torch .view(B, -1) order
    h = jnp.maximum(feat @ w1.T + b1, 0.0)
    return h @ w2.T + b2


if __name__ == "__main__":
    key = jax.random.PRNGKey(0)
    k_param, k_x = jax.random.split(key)
    params = init_params(k_param)
    kparams = prepare_kernel_params(params)          # hoisted, done once
    x = jax.random.normal(k_x, (B, C_IN, H_IN, W_IN), jnp.float32)

    out = jax.block_until_ready(mynet3_3_forward(x, *kparams))
    ref = jax.block_until_ready(reference_forward(x, params))

    assert out.shape == (B, NCLASS), out.shape
    # bf16 weights/activations at the two MXU dots -> loosen vs. f32 reference.
    assert jnp.allclose(out, ref, atol=2e-2, rtol=2e-2), (out, ref)

    print("KERNEL_OK")
</pallas_src>

<mosaic_0001>
module attributes {stable_mosaic.version = 11 : i64} {
  func.func @mynet_kernel(%arg0: memref<2x12xf32, #tpu.memory_space<vmem>>, %arg1: memref<24x512xf32, #tpu.memory_space<vmem>>, %arg2: memref<640x128xbf16, #tpu.memory_space<vmem>>, %arg3: memref<2x128xf32, #tpu.memory_space<vmem>>) attributes {dimension_semantics = [], scalar_prefetch = 0 : i64, scratch_operands = 0 : i64, tpu.core_type = #tpu.core_type<tc>} {
    %c0 = arith.constant 0 : index
    %c0_0 = arith.constant 0 : index
    %0 = vector.load %arg0[%c0, %c0_0] : memref<2x12xf32, #tpu.memory_space<vmem>>, vector<2x12xf32>
    %c0_1 = arith.constant 0 : index
    %c0_2 = arith.constant 0 : index
    %1 = vector.load %arg1[%c0_1, %c0_2] : memref<24x512xf32, #tpu.memory_space<vmem>>, vector<12x512xf32>
    %cst = arith.constant dense<0.000000e+00> : vector<2x512xf32>
    %2 = tpu.matmul %0, %1, %cst {dimension_numbers = #tpu.dot_dimension_numbers<[1], [0], [0], [1], [0, 0, 1, 1], [], []>} : vector<2x12xf32>, vector<12x512xf32>, vector<2x512xf32> -> vector<2x512xf32>
    %c16 = arith.constant 16 : index
    %c0_3 = arith.constant 0 : index
    %3 = vector.load %arg1[%c16, %c0_3] : memref<24x512xf32, #tpu.memory_space<vmem>>, vector<1x512xf32>
    %4 = vector.broadcast %3 : vector<1x512xf32> to vector<2x512xf32>
    %5 = arith.addf %2, %4 : vector<2x512xf32>
    %cst_4 = arith.constant 0.000000e+00 : f32
    %6 = vector.broadcast %cst_4 : f32 to vector<2x512xf32>
    %7 = arith.maximumf %5, %6 : vector<2x512xf32>
    %c480_i32 = arith.constant 480 : i32
    %8 = tpu.dynamic_rotate %7 by %c480_i32 dim 1 : vector<2x512xf32>, i32 -> vector<2x512xf32>
    %c384_i32 = arith.constant 384 : i32
    %9 = tpu.dynamic_rotate %7 by %c384_i32 dim 1 : vector<2x512xf32>, i32 -> vector<2x512xf32>
    %c384_i32_5 = arith.constant 384 : i32
    %10 = tpu.dynamic_rotate %8 by %c384_i32_5 dim 1 : vector<2x512xf32>, i32 -> vector<2x512xf32>
    %11 = arith.maximumf %7, %8 : vector<2x512xf32>
    %12 = arith.maximumf %9, %10 : vector<2x512xf32>
    %13 = arith.maximumf %11, %12 : vector<2x512xf32>
    %14 = arith.truncf %13 : vector<2x512xf32> to vector<2x512xbf16>
    %c0_6 = arith.constant 0 : index
    %c0_7 = arith.constant 0 : index
    %15 = vector.load %arg2[%c0_6, %c0_7] : memref<640x128xbf16, #tpu.memory_space<vmem>>, vector<512x128xbf16>
    %cst_8 = arith.constant dense<0.000000e+00> : vector<2x128xf32>
    %16 = tpu.matmul %14, %15, %cst_8 {dimension_numbers = #tpu.dot_dimension_numbers<[1], [0], [0], [1], [0, 0, 1, 1], [], []>} : vector<2x512xbf16>, vector<512x128xbf16>, vector<2x128xf32> -> vector<2x128xf32>
    %c17 = arith.constant 17 : index
    %c0_9 = arith.constant 0 : index
    %17 = vector.load %arg1[%c17, %c0_9] : memref<24x512xf32, #tpu.memory_space<vmem>>, vector<1x128xf32>
    %18 = vector.broadcast %17 : vector<1x128xf32> to vector<2x128xf32>
    %19 = arith.addf %16, %18 : vector<2x128xf32>
    %cst_10 = arith.constant 0.000000e+00 : f32
    %20 = vector.broadcast %cst_10 : f32 to vector<2x128xf32>
    %21 = arith.maximumf %19, %20 : vector<2x128xf32>
    %22 = arith.truncf %21 : vector<2x128xf32> to vector<2x128xbf16>
    %c512 = arith.constant 512 : index
    %c0_11 = arith.constant 0 : index
    %23 = vector.load %arg2[%c512, %c0_11] : memref<640x128xbf16, #tpu.memory_space<vmem>>, vector<128x128xbf16>
    %cst_12 = arith.constant dense<0.000000e+00> : vector<2x128xf32>
    %24 = tpu.matmul %22, %23, %cst_12 {dimension_numbers = #tpu.dot_dimension_numbers<[1], [0], [0], [1], [0, 0, 1, 1], [], []>} : vector<2x128xbf16>, vector<128x128xbf16>, vector<2x128xf32> -> vector<2x128xf32>
    %c18 = arith.constant 18 : index
    %c0_13 = arith.constant 0 : index
    %25 = vector.load %arg1[%c18, %c0_13] : memref<24x512xf32, #tpu.memory_space<vmem>>, vector<1x128xf32>
    %26 = vector.broadcast %25 : vector<1x128xf32> to vector<2x128xf32>
    %27 = arith.addf %24, %26 : vector<2x128xf32>
    %c0_14 = arith.constant 0 : index
    %c0_15 = arith.constant 0 : index
    %28 = vector.load %arg3[%c0_14, %c0_15] : memref<2x128xf32, #tpu.memory_space<vmem>>, vector<2x128xf32>
    tpu.vector_store %arg3[%c0_14, %c0_15], %27 {strides = array<i32>} : memref<2x128xf32, #tpu.memory_space<vmem>>, vector<2x128xf32>,
    return
  }
}

</mosaic_0001>

<bundles_post_ra>
// kernel: _forward_impl.1
= control target key start
LH: loop header
LB: loop body
LE: loop exit
PB: predicated region body
PF: predicated region fallthrough
CT: control target
= control target key end

     0   :  { %8 = vsyncpa [#allocation3], 0  ;;  %s1084_s0 = inlined_call_operand.vmem [shape: f32[2,12], index: 0, kind: input, shape index: {}]   ;;  %s1085_s1 = inlined_call_operand.hbm [shape: f32[24,512], index: 1, kind: input, shape index: {}]   ;;  %s1086_s2 = inlined_call_operand.hbm [shape: bf16[640,128], index: 2, kind: input, shape index: {}]   ;;  %s1087_s3 = inlined_call_operand.hbm [shape: f32[2,128], index: 3, kind: output, shape index: {}]  }
   0x1   :  { %9 = vsyncpa [#allocation6], 0 }
   0x2   :  { %10 = vsyncpa [#allocation4], 0  ;;  %s991_s12 = smov [#allocation2]   ;;  %s919_s16 = scalar_lea.hbm %s1085_s1, 1536 }
   0x3   :  { %s18_s13 = sshll.u32 %s991_s12, 4  ;;  %p920_p0 = scmp.ne.s32.totalorder %s1085_s1, %s919_s16  ;;  %s19_s13 = int_to_ptr.vmem [resolvable:$true] %s18_s13 }
   0x4   :  { %p923_p1 = scmp.lt.u32.totalorder %s919_s16, %s1085_s1 }
   0x6   :  { %p925_p2 = pnand %p923_p1, %p920_p0 }
   0x8   :  { %928 = shalt.err (!%p925_p2)
}
   0x9   :  { %s929_s21 = scalar_lea.vmem %s19_s13, 1536  ;;  %p934_p4 = scmp.lt.s32.totalorder %s19_s13, %s19_s13 }
   0xa   :  { %p930_p3 = scmp.ne.s32.totalorder %s19_s13, %s929_s21  ;;  %p935_p5 = scmp.lt.s32.totalorder %s929_s21, %s929_s21 }
   0xc   :  { %p936_p6 = por %p935_p5, %p934_p4 }
   0xe   :  { %p937_p7 = pnand %p936_p6, %p930_p3 }
  0x10   :  { %940 = shalt.err (!%p937_p7)
}
  0x11   :  { %s992_s22 = smov 512   ;;  %s993_s23 = smov 32  }
  0x12   :  { %24 = dma.hbm_to_vmem [thread:$0]  %s1085_s1, 1536, %s19_s13, [#allocation3], %s992_s22, %s992_s22, %s993_s23  }
  0x13   :  { %s994_s26 = smov [#allocation5]   ;;  %s941_s30 = scalar_lea.hbm %s1086_s2, 5120 }
  0x14   :  { %s30_s27 = sshll.u32 %s994_s26, 4  ;;  %p942_p8 = scmp.ne.s32.totalorder %s1086_s2, %s941_s30  ;;  %s31_s27 = int_to_ptr.vmem [resolvable:$true] %s30_s27 }
  0x15   :  { %p945_p9 = scmp.lt.u32.totalorder %s941_s30, %s1086_s2 }
  0x17   :  { %p947_p10 = pnand %p945_p9, %p942_p8 }
  0x19   :  { %950 = shalt.err (!%p947_p10)
}
  0x1a   :  { %s951_s8 = scalar_lea.vmem %s31_s27, 5120  ;;  %p956_p12 = scmp.lt.s32.totalorder %s31_s27, %s31_s27 }
  0x1b   :  { %p952_p11 = scmp.ne.s32.totalorder %s31_s27, %s951_s8  ;;  %p957_p13 = scmp.lt.s32.totalorder %s951_s8, %s951_s8 }
  0x1d   :  { %p958_p0 = por %p957_p13, %p956_p12 }
  0x1f   :  { %p959_p1 = pnand %p958_p0, %p952_p11 }
  0x21   :  { %962 = shalt.err (!%p959_p1)
}
  0x22   :  { %s995_s1 = smov 64   ;;  %s996_s9 = smov 4  }
  0x23   :  { %36 = dma.hbm_to_vmem [thread:$0]  %s1086_s2, 5120, %s31_s27, [#allocation6], %s995_s1, %s995_s1, %s996_s9  }
  0x24   :  { %985 = dma.done.wait [#allocation3], 1536  }
  0x25   :  { %986 = vsyncadd [#allocation3], 4294965760 }
  0x26   :  { %987 = dma.done.wait [#allocation6], 5120  }
  0x27   :  { %988 = vsyncadd [#allocation6], 4294962176  ;;  %v997_v0 = vmov 0.0   ;;  %vm80_vm0 = vcmask 1043456   ;;  %vm998_vm1 = vmmov 1   ;;  %v46_v2 = vld [vmem:[#allocation2 + $0x8] sm:$0xff]  ;;  %v56_v35 = vlaneseq }
  0x28   :  { %157 = vmatprep.mubr.f32.mxu1 %v997_v0  ;;  %vm1047_vm2 = vmpackc.low %vm80_vm0, %vm998_vm1  ;;  %v50_v3 = vld [vmem:[#allocation2 + $0x28] sm:$0xf]  ;;  %v45_v4 = vld [vmem:[#allocation2] sm:$0xff]  ;;  %vm76_vm3 = vcmask 97280   ;;  %vm1000_vm5 = vmmov 0   ;;  %s1001_s13 = smov [#allocation7]  }
  0x29   :  { %v846_v5 = vpack.c.bf16 %v50_v3, %v46_v2  ;;  %v49_v6 = vld [vmem:[#allocation2 + $0x20] sm:$0xf]  ;;  %v48_v7 = vld [vmem:[#allocation2 + $0x18] sm:$0xff]  ;;  %v47_v10 = vld [vmem:[#allocation2 + $0x10] sm:$0xff]  ;;  %v57_v36 = vshrl.u32 %v56_v35, 7  ;;  %s717_s14 = sshll.u32 %s1001_s13, 4  ;;  %s718_s14 = int_to_ptr.vmem [resolvable:$true] %s717_s14 }
  0x2a   :  { %v849_v8 = vpack.c.bf16 %v49_v6, %v45_v4  ;;  %v52_v9 = vld [vmem:[#allocation2 + $0x38] sm:$0xf]  ;;  %v51_v11 = vld [vmem:[#allocation2 + $0x30] sm:$0xf]  ;;  %v44_v12 = vld [vmem:[%s1084_s0] sm:$0x3]  ;;  %p968_p3 = scmp.lt.s32.totalorder %s718_s14, %s718_s14 }
  0x2b   :  { %848 = vmatprep.subr.msk.bf16.mxu1 %vm1047_vm2, %v846_v5  ;;  %v852_v13 = vpack.c.bf16 %v52_v9, %v48_v7  ;;  %v855_v14 = vpack.c.bf16 %v51_v11, %v47_v10  ;;  %v879_v15 = vld [vmem:[#allocation5 + $0x40] sm:$0xff]   ;;  %v883_v19 = vld [vmem:[#allocation5 + $0x48] sm:$0xff]   ;;  %v887_v23 = vld [vmem:[#allocation5 + $0x50] sm:$0xff]   ;;  %v62_v37 = vsub.s32 1, %v57_v36  ;;  %v66_v39 = vsub.s32 2, %v57_v36  ;;  %s999_s0 = smov 96  }
  0x2c   :  { %851 = vmatpush1.bf16.msk.msra.mxu1 %vm1047_vm2, %v849_v8  ;;  %v880_v16 = vld [vmem:[#allocation5 + $0xc0] sm:$0xff]   ;;  %v884_v20 = vld [vmem:[#allocation5 + $0xc8] sm:$0xff]   ;;  %773 = vmatprep.subr.bf16.mxu0 %v879_v15  ;;  %v888_v24 = vld [vmem:[#allocation5 + $0xd0] sm:$0xff]   ;;  %v70_v40 = vsub.s32 3, %v57_v36  ;;  %v58_v44 = vsub.s32 0, %v57_v36  ;;  %v248_v9 = vand.u32 127, %v56_v35 }
  0x2d   :  { %854 = vmatprep.subr.msk.bf16.mxu1 %vm1047_vm2, %v852_v13  ;;  %v881_v17 = vld [vmem:[#allocation5] sm:$0xff]   ;;  %v885_v21 = vld [vmem:[#allocation5 + $0x8] sm:$0xff]   ;;  %v889_v25 = vld [vmem:[#allocation5 + $0x10] sm:$0xff]   ;;  %s963_s15 = scalar_lea.vmem %s718_s14, 32 }
  0x2e   :  { %v882_v18 = vld [vmem:[#allocation5 + $0x80] sm:$0xff]   ;;  %774 = vmatpush3.bf16.msra.mxu0 %v881_v17  ;;  %v886_v22 = vld [vmem:[#allocation5 + $0x88] sm:$0xff]   ;;  %v890_v26 = vld [vmem:[#allocation5 + $0x90] sm:$0xff]   ;;  %vm249_vm4 = vcmp.lt.s32.totalorder %v248_v9, 96  ;;  %p964_p2 = scmp.ne.s32.totalorder %s718_s14, %s963_s15  ;;  %p969_p4 = scmp.lt.s32.totalorder %s963_s15, %s963_s15 }
  0x2f   :  { %729 = vmatmul.mubr.msk.f32.vlgmr.msra.gmra.mrb[0].mxu1 %vm76_vm3, %v44_v12  ;;  %775 = vmatprep.subr.bf16.mxu0 %v883_v19  ;;  %v891_v27 = vld [vmem:[#allocation5 + $0x58] sm:$0xff]   ;;  %v895_v31 = vld [vmem:[#allocation5 + $0x60] sm:$0xff]   ;;  %v899_v41 = vld [vmem:[#allocation5 + $0x68] sm:$0xff]  }
  0x30   :  { %857 = vmatpush1.bf16.msk.msra.mxu1 %vm1047_vm2, %v855_v14  ;;  %228 = vmatprep.mubr.f32.mxu1 %v997_v0  ;;  %v892_v28 = vld [vmem:[#allocation5 + $0xd8] sm:$0xff]   ;;  %v896_v32 = vld [vmem:[#allocation5 + $0xe0] sm:$0xff]   ;;  %v900_v42 = vld [vmem:[#allocation5 + $0xe8] sm:$0xff]   ;;  %p970_p5 = por %p969_p4, %p968_p3 }
  0x31   :  { %795 = vmatprep.subr.bf16.mxu1 %v880_v16  ;;  %v893_v29 = vld [vmem:[#allocation5 + $0x18] sm:$0xff]   ;;  %v897_v33 = vld [vmem:[#allocation5 + $0x20] sm:$0xff]   ;;  %v901_v43 = vld [vmem:[#allocation5 + $0x28] sm:$0xff]  }
  0x32   :  { %776 = vmatpush3.bf16.msra.mxu0 %v885_v21  ;;  %v894_v30 = vld [vmem:[#allocation5 + $0x98] sm:$0xff]   ;;  %v898_v34 = vld [vmem:[#allocation5 + $0xa0] sm:$0xff]   ;;  %v902_v46 = vld [vmem:[#allocation5 + $0xa8] sm:$0xff]   ;;  %p971_p6 = pnand %p970_p5, %p964_p2 }
  0x33   :  { %732 = vmatmul.mubr.msk.f32.vlgmr.msra.gmra.mrb[2].mxu1 %vm76_vm3, %v44_v12  ;;  %777 = vmatprep.subr.bf16.mxu0 %v887_v23  ;;  %v54_v38 = vld [vmem:[#allocation2 + $0x40] ss:$8 sm:$0xf] }
  0x34   :  { %796 = vmatpush3.bf16.msra.mxu1 %v882_v18  ;;  %v63_v45 = vrot.slane %v54_v38, %v62_v37  ;;  %v67_v49 = vrot.slane %v54_v38, %v66_v39  ;;  %v71_v50 = vrot.slane %v54_v38, %v70_v40  ;;  %v903_v51 = vld [vmem:[#allocation5 + $0x70] sm:$0xff]   ;;  %v59_v53 = vrot.slane %v54_v38, %v58_v44  ;;  %v907_v60 = vld [vmem:[#allocation5 + $0x78] sm:$0xff]   ;;  %v915_v36 = vld [vmem:[#allocation5 + $0x120] sm:$0xff]  }
  0x35   :  { %797 = vmatprep.subr.bf16.mxu1 %v884_v20  ;;  %v904_v52 = vld [vmem:[#allocation5 + $0xf0] sm:$0xff]   ;;  %v908_v61 = vld [vmem:[#allocation5 + $0xf8] sm:$0xff]   ;;  %v916_v37 = vld [vmem:[#allocation5 + $0x128] sm:$0xff]  }
  0x36   :  { %778 = vmatpush3.bf16.msra.mxu0 %v889_v25  ;;  %v905_v55 = vld [vmem:[#allocation5 + $0x30] sm:$0xff]   ;;  %v909_v62 = vld [vmem:[#allocation5 + $0x38] sm:$0xff]  }
  0x37   :  { %779 = vmatprep.subr.bf16.mxu0 %v891_v27  ;;  %v906_v56 = vld [vmem:[#allocation5 + $0xb0] sm:$0xff]   ;;  %v910_v1 = vld [vmem:[#allocation5 + $0xb8] sm:$0xff]  }
  0x38   :  { %798 = vmatpush3.bf16.msra.mxu1 %v886_v22  ;;  %v914_v35 = vld [vmem:[#allocation5 + $0x118] sm:$0xff]   ;;  %v917_v38 = vld [vmem:[#allocation5 + $0x130] sm:$0xff]  }
  0x39   :  { %799 = vmatprep.subr.bf16.mxu1 %v888_v24  ;;  %v918_v39 = vld [vmem:[#allocation5 + $0x138] sm:$0xff]  }
  0x3a   :  { %780 = vmatpush3.bf16.msra.mxu0 %v893_v29 }
  0x3b   :  { %781 = vmatprep.subr.bf16.mxu0 %v895_v31 }
  0x3c   :  { %800 = vmatpush3.bf16.msra.mxu1 %v890_v26 }
  0x3d   :  { %801 = vmatprep.subr.bf16.mxu1 %v892_v28 }
  0x3e   :  { %782 = vmatpush3.bf16.msra.mxu0 %v897_v33  ;;  %v912_v33 = vld [vmem:[#allocation5 + $0x108] sm:$0xff]  }
  0x3f   :  { %783 = vmatprep.subr.bf16.mxu0 %v899_v41 }
  0x40   :  { %802 = vmatpush3.bf16.msra.mxu1 %v894_v30 }
  0x41   :  { %803 = vmatprep.subr.bf16.mxu1 %v896_v32  ;;  %v911_v32 = vld [vmem:[#allocation5 + $0x100] sm:$0xff]  }
  0x42   :  { %784 = vmatpush3.bf16.msra.mxu0 %v901_v43 }
  0x43   :  { %785 = vmatprep.subr.bf16.mxu0 %v903_v51 }
  0x44   :  { %804 = vmatpush3.bf16.msra.mxu1 %v898_v34  ;;  %v913_v34 = vld [vmem:[#allocation5 + $0x110] sm:$0xff]  }
  0x45   :  { %805 = vmatprep.subr.bf16.mxu1 %v900_v42  ;;  %v330_v42 = vld [vmem:[#allocation2 + $0x41] ss:$0 sm:$0xff] }
  0x46   :  { %786 = vmatpush3.bf16.msra.mxu0 %v905_v55  ;;  %v621_v55 = vld [vmem:[#allocation2 + $0x42] ss:$0 sm:$0xff] }
  0x47   :  { %787 = vmatprep.subr.bf16.mxu0 %v907_v60 }
  0x48   :  { %806 = vmatpush3.bf16.msra.mxu1 %v902_v46 }
  0x49   :  { %807 = vmatprep.subr.bf16.mxu1 %v904_v52 }
  0x4a   :  { %788 = vmatpush3.bf16.msra.mxu0 %v909_v62 }
  0x4b   :  { %826 = vmatprep.subr.bf16.mxu0 %v997_v0 }
  0x4c   :  { %808 = vmatpush3.bf16.msra.mxu1 %v906_v56 }
  0x4d   :  { %809 = vmatprep.subr.bf16.mxu1 %v908_v61 }
  0x50   :  { %810 = vmatpush3.bf16.msra.mxu1 %v910_v1 }
 0x102   :  { %v159_v47 = vpop.f32.mrb[0].mxu1 }
 0x103   :  { %v161_v48 = vpop.f32.mrb[1].mxu1  ;;  %v160_v2 = vadd.f32 %v159_v47, %v59_v53 }
 0x104   :  { %v162_v54 = vadd.f32 %v161_v48, %v63_v45 }
 0x105   :  { %v235_v7 = vmax.f32 %v160_v2, 0.0 }
 0x106   :  { %v230_v57 = vpop.f32.mrb[2].mxu1  ;;  %v236_v3 = vmax.f32 %v162_v54, 0.0 }
 0x107   :  { %v231_v58 = vadd.f32 %v230_v57, %v67_v49  ;;  %v232_v59 = vpop.f32.mrb[3].mxu1 }
 0x108   :  { %v233_v63 = vadd.f32 %v232_v59, %v71_v50 }
 0x109   :  { %v237_v4 = vmax.f32 %v231_v58, 0.0 }
 0x10a   :  { %v238_v5 = vmax.f32 %v233_v63, 0.0 }
 0x10b   :  { %v869_v6 = vpack.i.bf16 %v237_v4, %v236_v3 }
 0x10c   :  { %v874_v8 = vpack.i.bf16 %v235_v7, %v238_v5 }
 0x10d   :  { %870 = vrot.lane.b32.xlu0 %v869_v6, %s999_s0 }
 0x111   :  { %875 = vrot.lane.b32.xlu0 %v874_v8, %s999_s0 }
 0x17f   :  { %v871_v10 = vpop.permute.xlu0 %870 }
 0x180   :  { %v873_v11 = vunpack.i.h.bf16 %v871_v10  ;;  %v872_v12 = vunpack.i.l.bf16 %v871_v10 }
 0x182   :  { %v251_v16 = vsel %vm249_vm4, %v872_v12, %v873_v11 }
 0x183   :  { %v876_v13 = vpop.permute.xlu0 %875  ;;  %v255_v22 = vmax.f32 %v236_v3, %v251_v16 }
 0x184   :  { %v878_v14 = vunpack.i.h.bf16 %v876_v13  ;;  %v877_v15 = vunpack.i.l.bf16 %v876_v13 }
 0x186   :  { %v252_v17 = vsel %vm249_vm4, %v878_v14, %v872_v12  ;;  %v253_v18 = vsel %vm249_vm4, %v877_v15, %v878_v14  ;;  %v250_v19 = vsel %vm249_vm4, %v873_v11, %v877_v15 }
 0x187   :  { %v254_v20 = vmax.f32 %v235_v7, %v252_v17  ;;  %v257_v21 = vmax.f32 %v238_v5, %v253_v18  ;;  %v256_v23 = vmax.f32 %v237_v4, %v250_v19 }
 0x189   :  { %v259_v24 = vmax.f32 %v255_v22, %v256_v23  ;;  %v260_v25 = vmax.f32 %v256_v23, %v257_v21  ;;  %v261_v26 = vmax.f32 %v257_v21, %v254_v20  ;;  %v258_v27 = vmax.f32 %v254_v20, %v255_v22 }
 0x18b   :  { %v263_v28 = vpack.c.bf16 %v259_v24, %v259_v24  ;;  %v264_v29 = vpack.c.bf16 %v260_v25, %v260_v25  ;;  %v265_v30 = vpack.c.bf16 %v261_v26, %v261_v26  ;;  %v262_v31 = vpack.c.bf16 %v258_v27, %v258_v27 }
 0x18d   :  { %555 = vmatprep.mubr.bf16.mxu0 %v263_v28  ;;  %595 = vmatprep.mubr.bf16.mxu1 %v265_v30 }
 0x18e   :  { %556 = vmatmul.mubr.bf16.vlgmr.msra.gmra.mrb[0].mxu0 %v262_v31  ;;  %596 = vmatmul.mubr.bf16.vlgmr.msra.gmra.mrb[4].mxu1 %v264_v29 }
 0x18f   :  { %827 = vmatpush3.bf16.msra.mxu0 %v911_v32  ;;  %842 = vmatprep.mubr.msk.bf16.mxu0 %vm1000_vm5, %v997_v0 }
 0x190   :  { %828 = vmatprep.subr.bf16.mxu0 %v997_v0 }
 0x193   :  { %829 = vmatpush3.bf16.msra.mxu0 %v912_v33 }
 0x194   :  { %830 = vmatprep.subr.bf16.mxu0 %v997_v0 }
 0x197   :  { %831 = vmatpush3.bf16.msra.mxu0 %v913_v34 }
 0x198   :  { %832 = vmatprep.subr.bf16.mxu0 %v997_v0 }
 0x19b   :  { %833 = vmatpush3.bf16.msra.mxu0 %v914_v35 }
 0x19c   :  { %834 = vmatprep.subr.bf16.mxu0 %v997_v0 }
 0x19f   :  { %835 = vmatpush3.bf16.msra.mxu0 %v915_v36 }
 0x1a0   :  { %836 = vmatprep.subr.bf16.mxu0 %v997_v0 }
 0x1a3   :  { %837 = vmatpush3.bf16.msra.mxu0 %v916_v37 }
 0x1a4   :  { %838 = vmatprep.subr.bf16.mxu0 %v997_v0 }
 0x1a7   :  { %839 = vmatpush3.bf16.msra.mxu0 %v917_v38 }
 0x1a8   :  { %840 = vmatprep.subr.bf16.mxu0 %v997_v0 }
 0x1ab   :  { %841 = vmatpush3.bf16.msra.mxu0 %v918_v39 }
 0x261   :  { %v789_v40 = vpop.f32.mrb[0].mxu0  ;;  %v811_v41 = vpop.f32.mrb[4].mxu1 }
 0x262   :  { %v790_v43 = vpop.f32.mrb[1].mxu0  ;;  %v812_v44 = vpop.f32.mrb[5].mxu1 }
 0x263   :  { %v791_v45 = vadd.f32 %v790_v43, %v789_v40  ;;  %v813_v46 = vadd.f32 %v812_v44, %v811_v41  ;;  %v792_v47 = vpop.f32.mrb[2].mxu0  ;;  %v814_v48 = vpop.f32.mrb[6].mxu1 }
 0x264   :  { %v793_v49 = vpop.f32.mrb[3].mxu0  ;;  %v815_v50 = vpop.f32.mrb[7].mxu1 }
 0x265   :  { %v558_v51 = vadd.f32 %v791_v45, %v330_v42 }
 0x267   :  { %v598_v52 = vadd.f32 %v813_v46, %v558_v51 }
 0x269   :  { %v603_v53 = vmax.f32 %v598_v52, 0.0 }
 0x26b   :  { %v604_v54 = vpack.c.bf16 %v603_v53, %v603_v53 }
 0x26d   :  { %843 = vmatmul.mubr.bf16.vlgmr.msra.gmra.mrb[4].mxu0 %v604_v54 }
 0x340   :  { %v704_v0 = vpop.f32.mrb[4].mxu0 }
 0x341   :  { %v705_v56 = vadd.f32 %v704_v0, %v621_v55  ;;  %v844_v57 = vpop.f32.mrb[5].mxu0 }
 0x342   :  { %v707_v58 = vpop.f32.mrb[6].mxu0 }
 0x343   :  { %710 = vst [vmem:[#allocation7] sm:$0x3] %v705_v56  ;;  %v845_v59 = vpop.f32.mrb[7].mxu0 }
 0x344   :  { %974 = shalt.err (!%p971_p6)
}
 0x345   :  { %s975_s18 = scalar_lea.hbm %s1087_s3, 32 }
 0x346   :  { %p976_p7 = scmp.ne.s32.totalorder %s1087_s3, %s975_s18  ;;  %p979_p8 = scmp.lt.u32.totalorder %s975_s18, %s1087_s3 }
 0x348   :  { %p981_p9 = pnand %p979_p8, %p976_p7 }
 0x34a   :  { %984 = shalt.err (!%p981_p9)
}
 0x34b   :  { %720 = dma.vmem_to_hbm [thread:$0]  %s718_s14, 32, %s1087_s3, [#allocation4]  }
 0x34c   :  { %989 = dma.done.wait [#allocation4], 32  }
 0x34d   :  { %990 = vsyncadd [#allocation4], 4294967264 }
 0x34e   :  { %724 = vsyncpa [#allocation3], 1 }
 0x34f   :  { %725 = vsyncpa [#allocation6], 1 }
 0x350   :  { %726 = vsyncpa [#allocation4], 1 }

</bundles_post_ra>
